<compile_context>
chip_gen: v6e
topology: v6e:2x2x1
jax: 0.10.0
libtpu: 0.0.40
codegen_flags: <defaults>
</compile_context>

<pallas_src>
import math

import jax
import jax.numpy as jnp
from jax.experimental import pallas as pl
from jax.experimental.pallas import tpu as pltpu

OB_CLAMP_LO, OB_CLAMP_HI = -5.0, 5.0
LN_EPS = 1e-5          # torch.nn.LayerNorm default
_BIG = 1e30            # "no clamp" sentinel for the action slice


def _round_up(x, m):
    return (x + m - 1) // m * m


# ----------------------------------------------------------------------------
# Kernel: one (D, TB) batch tile (batch on lanes) per grid step.
#   prep: (D, 4)  f32  columns = [mean, inv_std, clamp_lo, clamp_hi]
#   v1:   (H1, 4) f32  columns = [b1, ln1_g, ln1_b, aux1];   aux1[0] = mean(b1)
#   w1:   (H1+1, D) bf16  rows 0..H1-1 = torch W1 (out,in); row H1 = col-mean of W1
#   v2:   (H2, 5) f32  columns = [b2, ln2_g, ln2_b, w_head, aux2];
#                      aux2[0] = mean(b2), aux2[1] = b_head
#   w2:   (H2+1, H1) bf16  (same layout as w1)
#   out:  (1, 1, TB) f32  -> lane-dense store
# ----------------------------------------------------------------------------
def _ra_fwd_kernel(x_ref, prep_ref, v1_ref, w1_ref, v2_ref, w2_ref, out_ref):
    H1 = w1_ref.shape[0] - 1
    H2 = w2_ref.shape[0] - 1

    # standardize + clamp in f32 (action slice has mean=0, inv_std=1, clamp=+-BIG).
    # Sublane-padding rows (D..31) may hold garbage, but the matmul's K padding is
    # masked by the compiler, so it never reaches the result.
    x = x_ref[...]                                            # (D, TB)
    x = (x - prep_ref[:, 0:1]) * prep_ref[:, 1:2]
    x = jnp.clip(x, prep_ref[:, 2:3], prep_ref[:, 3:4])

    # fc_block_1: Linear (bf16 MXU, LN mean folded as extra row) + LayerNorm + ReLU
    hx = jnp.dot(w1_ref[...], x.astype(jnp.bfloat16),
                 preferred_element_type=jnp.float32)          # (H1+1, TB)
    h = hx[:H1, :] + v1_ref[:, 0:1]                           # + b1
    mu = hx[H1:H1 + 1, :] + v1_ref[0:1, 3:4]                  # MXU row-mean + mean(b1)
    d = h - mu
    var = jnp.mean(d * d, axis=0, keepdims=True)              # (1, TB) sublane reduce
    h = d * jax.lax.rsqrt(var + LN_EPS)
    h = jnp.maximum(h * v1_ref[:, 1:2] + v1_ref[:, 2:3], 0.0)

    # fc_block_2: Linear + LayerNorm + ReLU
    hx = jnp.dot(w2_ref[...], h.astype(jnp.bfloat16),
                 preferred_element_type=jnp.float32)          # (H2+1, TB)
    h = hx[:H2, :] + v2_ref[:, 0:1]
    mu = hx[H2:H2 + 1, :] + v2_ref[0:1, 4:5]
    d = h - mu
    var = jnp.mean(d * d, axis=0, keepdims=True)
    h = d * jax.lax.rsqrt(var + LN_EPS)
    h = jnp.maximum(h * v2_ref[:, 1:2] + v2_ref[:, 2:3], 0.0)

    # head: Linear(H2 -> 1) as a sublane reduce; batch stays on lanes -> dense store.
    y = jnp.sum(h * v2_ref[:, 3:4], axis=0, keepdims=True) + v2_ref[1:2, 4:5]  # (1, TB)
    out_ref[...] = y.reshape(out_ref.shape).astype(out_ref.dtype)


def reward_averager_forward(ob, ac, next_ob, params, *, block_b=1024):
    """Fused RewardAverager.forward. Returns (B, 1) scores."""
    # Feature-major input: (D, B) so the batch is on the lane axis inside the kernel.
    xT = jnp.concatenate([ob.T, ac.T, next_ob.T], axis=0).astype(jnp.float32)
    D, B = xT.shape

    # Lane-aligned batch tile; cap it so the grid has >=2 steps when B allows it
    # (keeps both v7x TensorCores busy; harmless extra loop iteration on v5e/v6e).
    TB = max(128, min(_round_up(block_b, 128), _round_up(max(B // 2, 1), 128)))
    Bp = _round_up(B, TB)
    if Bp != B:
        xT = jnp.pad(xT, ((0, 0), (0, Bp - B)))
    G = Bp // TB

    cparams = dict(dimension_semantics=("parallel",))
    if TB >= 4096:
        # v5e's default scoped-VMEM budget (16 MiB) needs headroom for huge tiles.
        cparams["vmem_limit_bytes"] = 48 * 1024 * 1024

    prep, v1, w1, v2, w2 = (params["prep"], params["v1"], params["w1"],
                            params["v2"], params["w2"])
    out = pl.pallas_call(
        _ra_fwd_kernel,
        out_shape=jax.ShapeDtypeStruct((G, 1, TB), jnp.float32),
        grid_spec=pltpu.PrefetchScalarGridSpec(
            num_scalar_prefetch=0,
            grid=(G,),
            in_specs=[
                pl.BlockSpec((D, TB), lambda i: (0, i)),     # batch-tiled activations
                pl.BlockSpec(prep.shape, lambda i: (0, 0)),  # params: constant block ->
                pl.BlockSpec(v1.shape, lambda i: (0, 0)),    # VMEM-resident, no re-DMA
                pl.BlockSpec(w1.shape, lambda i: (0, 0)),
                pl.BlockSpec(v2.shape, lambda i: (0, 0)),
                pl.BlockSpec(w2.shape, lambda i: (0, 0)),
            ],
            out_specs=pl.BlockSpec((1, 1, TB), lambda i: (i, 0, 0)),   # lane-dense out
        ),
        compiler_params=pltpu.CompilerParams(**cparams),
    )(xT, prep, v1, w1, v2, w2)

    # (G, 1, TB) -> (B, 1).  Note: for very small B the XLA-fused path is competitive;
    # the kernel is kept for uniformity.
    return out.reshape(Bp)[:B].reshape(B, 1)


# ----------------------------------------------------------------------------
# Deterministic parameter construction (orthogonal init; LN weight=1, bias=0),
# plus packing into the 5 kernel buffers (feature-major layout).
# ----------------------------------------------------------------------------
def _orthogonal(key, out_dim, in_dim, gain):
    a = jax.random.normal(key, (max(out_dim, in_dim), min(out_dim, in_dim)), jnp.float32)
    q, r = jnp.linalg.qr(a)
    q = q * jnp.sign(jnp.diagonal(r))[None, :]
    w = q if out_dim >= in_dim else q.T          # (out_dim, in_dim)
    return gain * w[:out_dim, :in_dim]


def make_params(key, ob_dim, ac_dim, hidden_dims):
    h1, h2 = hidden_dims
    D = ob_dim + ac_dim + ob_dim
    k1, k2, k3, k4, k5 = jax.random.split(key, 5)

    # torch layout (out, in); kept that way (kernel is feature-major)
    w1_t = _orthogonal(k1, h1, D, math.sqrt(2.0))          # (h1, D)
    w2_t = _orthogonal(k2, h2, h1, math.sqrt(2.0))         # (h2, h1)
    wh_t = _orthogonal(k3, 1, h2, 0.01)                    # (1, h2)
    b1 = jnp.zeros((h1,), jnp.float32)
    b2 = jnp.zeros((h2,), jnp.float32)
    bh = jnp.zeros((), jnp.float32)
    g1 = jnp.ones((h1,), jnp.float32); be1 = jnp.zeros((h1,), jnp.float32)
    g2 = jnp.ones((h2,), jnp.float32); be2 = jnp.zeros((h2,), jnp.float32)

    # synthetic, deterministic running stats; reciprocal precomputed with a floor
    rms_mean = 0.1 * jax.random.normal(k4, (ob_dim,), jnp.float32)
    rms_std = 1.0 + 0.1 * jnp.abs(jax.random.normal(k5, (ob_dim,), jnp.float32))
    rms_inv_std = 1.0 / jnp.maximum(rms_std, 1e-8)

    # per-feature preprocessing columns over the concat width [ob | ac | next_ob]
    mean_full = jnp.concatenate([rms_mean, jnp.zeros((ac_dim,), jnp.float32), rms_mean])
    inv_full = jnp.concatenate([rms_inv_std, jnp.ones((ac_dim,), jnp.float32), rms_inv_std])
    lo_full = jnp.concatenate([jnp.full((ob_dim,), OB_CLAMP_LO, jnp.float32),
                               jnp.full((ac_dim,), -_BIG, jnp.float32),
                               jnp.full((ob_dim,), OB_CLAMP_LO, jnp.float32)])
    hi_full = jnp.concatenate([jnp.full((ob_dim,), OB_CLAMP_HI, jnp.float32),
                               jnp.full((ac_dim,), _BIG, jnp.float32),
                               jnp.full((ob_dim,), OB_CLAMP_HI, jnp.float32)])
    prep = jnp.stack([mean_full, inv_full, lo_full, hi_full], axis=1)   # (D, 4)

    # bf16 MXU weights with the LayerNorm row-mean folded in as one extra output row
    # (the MXU then produces mu directly; removes one XLU reduction per block).
    w1p = jnp.concatenate([w1_t, jnp.mean(w1_t, axis=0, keepdims=True)],
                          axis=0).astype(jnp.bfloat16)                  # (h1+1, D)
    w2p = jnp.concatenate([w2_t, jnp.mean(w2_t, axis=0, keepdims=True)],
                          axis=0).astype(jnp.bfloat16)                  # (h2+1, h1)

    aux1 = jnp.zeros((h1,), jnp.float32).at[0].set(jnp.mean(b1))
    v1 = jnp.stack([b1, g1, be1, aux1], axis=1)                         # (h1, 4)
    aux2 = jnp.zeros((h2,), jnp.float32).at[0].set(jnp.mean(b2)).at[1].set(bh)
    v2 = jnp.stack([b2, g2, be2, wh_t[0], aux2], axis=1)                # (h2, 5)

    return {
        # packed (kernel) buffers
        "prep": prep, "v1": v1, "w1": w1p, "v2": v2, "w2": w2p,
        # raw f32 params (pure-JAX reference)
        "rms_mean": rms_mean, "rms_inv_std": rms_inv_std,
        "w1_raw": w1_t.T, "b1": b1, "ln1_g": g1, "ln1_b": be1,
        "w2_raw": w2_t.T, "b2": b2, "ln2_g": g2, "ln2_b": be2,
        "w_head": wh_t.T, "b_head": bh,
    }


# Pure-JAX reference (f32, torch-style two-pass LayerNorm) for validation.
def reward_averager_forward_ref(ob, ac, next_ob, p):
    obn = jnp.clip((ob - p["rms_mean"]) * p["rms_inv_std"], OB_CLAMP_LO, OB_CLAMP_HI)
    nobn = jnp.clip((next_ob - p["rms_mean"]) * p["rms_inv_std"], OB_CLAMP_LO, OB_CLAMP_HI)
    x = jnp.concatenate([obn, ac, nobn], axis=-1)

    def block(h, w, b, g, beta):
        h = h @ w + b
        mu = h.mean(-1, keepdims=True)
        var = jnp.mean(jnp.square(h - mu), -1, keepdims=True)
        h = (h - mu) * jax.lax.rsqrt(var + LN_EPS) * g + beta
        return jnp.maximum(h, 0.0)

    h = block(x, p["w1_raw"], p["b1"], p["ln1_g"], p["ln1_b"])
    h = block(h, p["w2_raw"], p["b2"], p["ln2_g"], p["ln2_b"])
    return h @ p["w_head"] + p["b_head"]


if __name__ == "__main__":
    # Small continuous-control shapes; B=200 exercises batch padding and a 2-step grid.
    B, OB_DIM, AC_DIM = 200, 11, 3
    HIDDEN_DIMS = (32, 32)

    key = jax.random.PRNGKey(0)
    k_ob, k_ac, k_nob, k_par = jax.random.split(key, 4)
    ob = jax.random.normal(k_ob, (B, OB_DIM), jnp.float32)
    ac = jax.random.normal(k_ac, (B, AC_DIM), jnp.float32)
    next_ob = jax.random.normal(k_nob, (B, OB_DIM), jnp.float32)
    params = make_params(k_par, OB_DIM, AC_DIM, HIDDEN_DIMS)

    out = jax.block_until_ready(reward_averager_forward(ob, ac, next_ob, params))
    ref = reward_averager_forward_ref(ob, ac, next_ob, params)

    assert out.shape == (B, 1)
    assert bool(jnp.all(jnp.isfinite(out)))
    # bf16 MXU operands -> tolerance loosened vs the f32 reference.
    err = float(jnp.max(jnp.abs(out - ref)))
    assert jnp.allclose(out, ref, atol=2e-3, rtol=5e-2), f"mismatch vs reference: {err}"
    print("KERNEL_OK")
</pallas_src>

<mosaic_0001>
module attributes {stable_mosaic.version = 11 : i64} {
  func.func @_ra_fwd_kernel(%arg0: i32, %arg1: memref<25x128xf32, #tpu.memory_space<vmem>>, %arg2: memref<25x4xf32, #tpu.memory_space<vmem>>, %arg3: memref<32x4xf32, #tpu.memory_space<vmem>>, %arg4: memref<33x25xbf16, #tpu.memory_space<vmem>>, %arg5: memref<32x5xf32, #tpu.memory_space<vmem>>, %arg6: memref<33x32xbf16, #tpu.memory_space<vmem>>, %arg7: memref<1x1x128xf32, #tpu.memory_space<vmem>>) attributes {dimension_semantics = [#tpu.dimension_semantics<parallel>], iteration_bounds = array<i64: 2>, scalar_prefetch = 0 : i64, scratch_operands = 0 : i64, tpu.core_type = #tpu.core_type<tc>, window_params = [{transform_indices = @transform_0, window_bounds = array<i64: 25, 128>}, {pipeline_mode = #tpu.pipeline_mode<synchronous>, transform_indices = @transform_1, window_bounds = array<i64: 25, 4>}, {pipeline_mode = #tpu.pipeline_mode<synchronous>, transform_indices = @transform_2, window_bounds = array<i64: 32, 4>}, {pipeline_mode = #tpu.pipeline_mode<synchronous>, transform_indices = @transform_3, window_bounds = array<i64: 33, 25>}, {pipeline_mode = #tpu.pipeline_mode<synchronous>, transform_indices = @transform_4, window_bounds = array<i64: 32, 5>}, {pipeline_mode = #tpu.pipeline_mode<synchronous>, transform_indices = @transform_5, window_bounds = array<i64: 33, 32>}, {transform_indices = @transform_6, window_bounds = array<i64: 1, 1, 128>}]} {
    %c0 = arith.constant 0 : index
    %c0_0 = arith.constant 0 : index
    %0 = vector.load %arg1[%c0, %c0_0] : memref<25x128xf32, #tpu.memory_space<vmem>>, vector<25x128xf32>
    %c0_1 = arith.constant 0 : index
    %c0_2 = arith.constant 0 : index
    %1 = vector.load %arg2[%c0_1, %c0_2] : memref<25x4xf32, #tpu.memory_space<vmem>>, vector<25x1xf32>
    %2 = vector.broadcast %1 : vector<25x1xf32> to vector<25x128xf32>
    %3 = arith.subf %0, %2 : vector<25x128xf32>
    %c0_3 = arith.constant 0 : index
    %c1 = arith.constant 1 : index
    %4 = vector.load %arg2[%c0_3, %c1] : memref<25x4xf32, #tpu.memory_space<vmem>>, vector<25x1xf32>
    %5 = vector.broadcast %4 : vector<25x1xf32> to vector<25x128xf32>
    %6 = arith.mulf %3, %5 : vector<25x128xf32>
    %c0_4 = arith.constant 0 : index
    %c2 = arith.constant 2 : index
    %7 = vector.load %arg2[%c0_4, %c2] : memref<25x4xf32, #tpu.memory_space<vmem>>, vector<25x1xf32>
    %c0_5 = arith.constant 0 : index
    %c3 = arith.constant 3 : index
    %8 = vector.load %arg2[%c0_5, %c3] : memref<25x4xf32, #tpu.memory_space<vmem>>, vector<25x1xf32>
    %9 = vector.broadcast %7 : vector<25x1xf32> to vector<25x128xf32>
    %10 = arith.maximumf %9, %6 : vector<25x128xf32>
    %11 = vector.broadcast %8 : vector<25x1xf32> to vector<25x128xf32>
    %12 = arith.minimumf %11, %10 : vector<25x128xf32>
    %c0_6 = arith.constant 0 : index
    %c0_7 = arith.constant 0 : index
    %13 = vector.load %arg4[%c0_6, %c0_7] : memref<33x25xbf16, #tpu.memory_space<vmem>>, vector<33x25xbf16>
    %14 = arith.truncf %12 : vector<25x128xf32> to vector<25x128xbf16>
    %cst = arith.constant dense<0.000000e+00> : vector<33x128xf32>
    %15 = tpu.matmul %13, %14, %cst {dimension_numbers = #tpu.dot_dimension_numbers<[1], [0], [0], [1], [0, 0, 1, 1], [], []>} : vector<33x25xbf16>, vector<25x128xbf16>, vector<33x128xf32> -> vector<33x128xf32>
    %16 = vector.extract_strided_slice %15 {offsets = [0, 0], sizes = [32, 128], strides = [1, 1]} : vector<33x128xf32> to vector<32x128xf32>
    %c0_8 = arith.constant 0 : index
    %c0_9 = arith.constant 0 : index
    %17 = vector.load %arg3[%c0_8, %c0_9] : memref<32x4xf32, #tpu.memory_space<vmem>>, vector<32x1xf32>
    %18 = vector.broadcast %17 : vector<32x1xf32> to vector<32x128xf32>
    %19 = arith.addf %16, %18 : vector<32x128xf32>
    %20 = vector.extract_strided_slice %15 {offsets = [32, 0], sizes = [1, 128], strides = [1, 1]} : vector<33x128xf32> to vector<1x128xf32>
    %c0_10 = arith.constant 0 : index
    %c3_11 = arith.constant 3 : index
    %21 = vector.load %arg3[%c0_10, %c3_11] : memref<32x4xf32, #tpu.memory_space<vmem>>, vector<1x1xf32>
    %22 = vector.broadcast %21 : vector<1x1xf32> to vector<1x128xf32>
    %23 = arith.addf %20, %22 : vector<1x128xf32>
    %24 = vector.broadcast %23 : vector<1x128xf32> to vector<32x128xf32>
    %25 = arith.subf %19, %24 : vector<32x128xf32>
    %26 = arith.mulf %25, %25 : vector<32x128xf32>
    %cst_12 = arith.constant dense<0.000000e+00> : vector<128xf32>
    %27 = vector.multi_reduction <add>, %26, %cst_12 [0] : vector<32x128xf32> to vector<128xf32>
    %28 = vector.shape_cast %27 : vector<128xf32> to vector<1x128xf32>
    %cst_13 = arith.constant 3.200000e+01 : f32
    %29 = vector.broadcast %cst_13 : f32 to vector<1x128xf32>
    %30 = arith.divf %28, %29 : vector<1x128xf32>
    %cst_14 = arith.constant 9.99999974E-6 : f32
    %31 = vector.broadcast %cst_14 : f32 to vector<1x128xf32>
    %32 = arith.addf %30, %31 : vector<1x128xf32>
    %33 = math.rsqrt %32 : vector<1x128xf32>
    %34 = vector.broadcast %33 : vector<1x128xf32> to vector<32x128xf32>
    %35 = arith.mulf %25, %34 : vector<32x128xf32>
    %c0_15 = arith.constant 0 : index
    %c1_16 = arith.constant 1 : index
    %36 = vector.load %arg3[%c0_15, %c1_16] : memref<32x4xf32, #tpu.memory_space<vmem>>, vector<32x1xf32>
    %37 = vector.broadcast %36 : vector<32x1xf32> to vector<32x128xf32>
    %38 = arith.mulf %35, %37 : vector<32x128xf32>
    %c0_17 = arith.constant 0 : index
    %c2_18 = arith.constant 2 : index
    %39 = vector.load %arg3[%c0_17, %c2_18] : memref<32x4xf32, #tpu.memory_space<vmem>>, vector<32x1xf32>
    %40 = vector.broadcast %39 : vector<32x1xf32> to vector<32x128xf32>
    %41 = arith.addf %38, %40 : vector<32x128xf32>
    %cst_19 = arith.constant 0.000000e+00 : f32
    %42 = vector.broadcast %cst_19 : f32 to vector<32x128xf32>
    %43 = arith.maximumf %41, %42 : vector<32x128xf32>
    %c0_20 = arith.constant 0 : index
    %c0_21 = arith.constant 0 : index
    %44 = vector.load %arg6[%c0_20, %c0_21] : memref<33x32xbf16, #tpu.memory_space<vmem>>, vector<33x32xbf16>
    %45 = arith.truncf %43 : vector<32x128xf32> to vector<32x128xbf16>
    %cst_22 = arith.constant dense<0.000000e+00> : vector<33x128xf32>
    %46 = tpu.matmul %44, %45, %cst_22 {dimension_numbers = #tpu.dot_dimension_numbers<[1], [0], [0], [1], [0, 0, 1, 1], [], []>} : vector<33x32xbf16>, vector<32x128xbf16>, vector<33x128xf32> -> vector<33x128xf32>
    %47 = vector.extract_strided_slice %46 {offsets = [0, 0], sizes = [32, 128], strides = [1, 1]} : vector<33x128xf32> to vector<32x128xf32>
    %c0_23 = arith.constant 0 : index
    %c0_24 = arith.constant 0 : index
    %48 = vector.load %arg5[%c0_23, %c0_24] : memref<32x5xf32, #tpu.memory_space<vmem>>, vector<32x1xf32>
    %49 = vector.broadcast %48 : vector<32x1xf32> to vector<32x128xf32>
    %50 = arith.addf %47, %49 : vector<32x128xf32>
    %51 = vector.extract_strided_slice %46 {offsets = [32, 0], sizes = [1, 128], strides = [1, 1]} : vector<33x128xf32> to vector<1x128xf32>
    %c0_25 = arith.constant 0 : index
    %c4 = arith.constant 4 : index
    %52 = vector.load %arg5[%c0_25, %c4] : memref<32x5xf32, #tpu.memory_space<vmem>>, vector<1x1xf32>
    %53 = vector.broadcast %52 : vector<1x1xf32> to vector<1x128xf32>
    %54 = arith.addf %51, %53 : vector<1x128xf32>
    %55 = vector.broadcast %54 : vector<1x128xf32> to vector<32x128xf32>
    %56 = arith.subf %50, %55 : vector<32x128xf32>
    %57 = arith.mulf %56, %56 : vector<32x128xf32>
    %cst_26 = arith.constant dense<0.000000e+00> : vector<128xf32>
    %58 = vector.multi_reduction <add>, %57, %cst_26 [0] : vector<32x128xf32> to vector<128xf32>
    %59 = vector.shape_cast %58 : vector<128xf32> to vector<1x128xf32>
    %cst_27 = arith.constant 3.200000e+01 : f32
    %60 = vector.broadcast %cst_27 : f32 to vector<1x128xf32>
    %61 = arith.divf %59, %60 : vector<1x128xf32>
    %cst_28 = arith.constant 9.99999974E-6 : f32
    %62 = vector.broadcast %cst_28 : f32 to vector<1x128xf32>
    %63 = arith.addf %61, %62 : vector<1x128xf32>
    %64 = math.rsqrt %63 : vector<1x128xf32>
    %65 = vector.broadcast %64 : vector<1x128xf32> to vector<32x128xf32>
    %66 = arith.mulf %56, %65 : vector<32x128xf32>
    %c0_29 = arith.constant 0 : index
    %c1_30 = arith.constant 1 : index
    %67 = vector.load %arg5[%c0_29, %c1_30] : memref<32x5xf32, #tpu.memory_space<vmem>>, vector<32x1xf32>
    %68 = vector.broadcast %67 : vector<32x1xf32> to vector<32x128xf32>
    %69 = arith.mulf %66, %68 : vector<32x128xf32>
    %c0_31 = arith.constant 0 : index
    %c2_32 = arith.constant 2 : index
    %70 = vector.load %arg5[%c0_31, %c2_32] : memref<32x5xf32, #tpu.memory_space<vmem>>, vector<32x1xf32>
    %71 = vector.broadcast %70 : vector<32x1xf32> to vector<32x128xf32>
    %72 = arith.addf %69, %71 : vector<32x128xf32>
    %cst_33 = arith.constant 0.000000e+00 : f32
    %73 = vector.broadcast %cst_33 : f32 to vector<32x128xf32>
    %74 = arith.maximumf %72, %73 : vector<32x128xf32>
    %c0_34 = arith.constant 0 : index
    %c3_35 = arith.constant 3 : index
    %75 = vector.load %arg5[%c0_34, %c3_35] : memref<32x5xf32, #tpu.memory_space<vmem>>, vector<32x1xf32>
    %76 = vector.broadcast %75 : vector<32x1xf32> to vector<32x128xf32>
    %77 = arith.mulf %74, %76 : vector<32x128xf32>
    %cst_36 = arith.constant dense<0.000000e+00> : vector<128xf32>
    %78 = vector.multi_reduction <add>, %77, %cst_36 [0] : vector<32x128xf32> to vector<128xf32>
    %79 = vector.shape_cast %78 : vector<128xf32> to vector<1x128xf32>
    %c1_37 = arith.constant 1 : index
    %c4_38 = arith.constant 4 : index
    %80 = vector.load %arg5[%c1_37, %c4_38] : memref<32x5xf32, #tpu.memory_space<vmem>>, vector<1x1xf32>
    %81 = vector.broadcast %80 : vector<1x1xf32> to vector<1x128xf32>
    %82 = arith.addf %79, %81 : vector<1x128xf32>
    %83 = vector.shape_cast %82 : vector<1x128xf32> to vector<1x1x128xf32>
    %c0_39 = arith.constant 0 : index
    %c0_40 = arith.constant 0 : index
    %c0_41 = arith.constant 0 : index
    %84 = vector.load %arg7[%c0_39, %c0_40, %c0_41] : memref<1x1x128xf32, #tpu.memory_space<vmem>>, vector<1x1x128xf32>
    tpu.vector_store %arg7[%c0_39, %c0_40, %c0_41], %83 {strides = array<i32>} : memref<1x1x128xf32, #tpu.memory_space<vmem>>, vector<1x1x128xf32>,
    return
  }
  func.func @transform_0(%arg0: i32) -> (i32, i32) {
    %c0_i32 = arith.constant 0 : i32
    %c0_i32_0 = arith.constant 0 : i32
    return %c0_i32, %arg0 : i32, i32
  }
  func.func @transform_1(%arg0: i32) -> (i32, i32) {
    %c0_i32 = arith.constant 0 : i32
    %c0_i32_0 = arith.constant 0 : i32
    %c0_i32_1 = arith.constant 0 : i32
    return %c0_i32, %c0_i32_0 : i32, i32
  }
  func.func @transform_2(%arg0: i32) -> (i32, i32) {
    %c0_i32 = arith.constant 0 : i32
    %c0_i32_0 = arith.constant 0 : i32
    %c0_i32_1 = arith.constant 0 : i32
    return %c0_i32, %c0_i32_0 : i32, i32
  }
  func.func @transform_3(%arg0: i32) -> (i32, i32) {
    %c0_i32 = arith.constant 0 : i32
    %c0_i32_0 = arith.constant 0 : i32
    %c0_i32_1 = arith.constant 0 : i32
    return %c0_i32, %c0_i32_0 : i32, i32
  }
  func.func @transform_4(%arg0: i32) -> (i32, i32) {
    %c0_i32 = arith.constant 0 : i32
    %c0_i32_0 = arith.constant 0 : i32
    %c0_i32_1 = arith.constant 0 : i32
    return %c0_i32, %c0_i32_0 : i32, i32
  }
  func.func @transform_5(%arg0: i32) -> (i32, i32) {
    %c0_i32 = arith.constant 0 : i32
    %c0_i32_0 = arith.constant 0 : i32
    %c0_i32_1 = arith.constant 0 : i32
    return %c0_i32, %c0_i32_0 : i32, i32
  }
  func.func @transform_6(%arg0: i32) -> (i32, i32, i32) {
    %c0_i32 = arith.constant 0 : i32
    %c0_i32_0 = arith.constant 0 : i32
    %c0_i32_1 = arith.constant 0 : i32
    return %arg0, %c0_i32, %c0_i32_0 : i32, i32, i32
  }
}

</mosaic_0001>

<bundles_post_ra>
// kernel: tpu_custom_call.1
= control target key start
LH: loop header
LB: loop body
LE: loop exit
PB: predicated region body
PF: predicated region fallthrough
CT: control target
= control target key end

     0   :  { %11 = vsyncpa [#allocation4], 0  ;;  %s1378_s0 = inlined_call_operand.vmem [shape: f32[25,256], index: 0, kind: input, shape index: {}]   ;;  %s1379_s1 = inlined_call_operand.vmem [shape: f32[25,4], index: 1, kind: input, shape index: {}]   ;;  %s1380_s2 = inlined_call_operand.vmem [shape: f32[32,4], index: 2, kind: input, shape index: {}]   ;;  %s1381_s3 = inlined_call_operand.vmem [shape: bf16[33,25], index: 3, kind: input, shape index: {}]   ;;  %s1382_s4 = inlined_call_operand.vmem [shape: f32[32,5], index: 4, kind: input, shape index: {}]   ;;  %s1383_s5 = inlined_call_operand.vmem [shape: bf16[33,32], index: 5, kind: input, shape index: {}]   ;;  %s1384_s6 = inlined_call_operand.hbm [shape: f32[2,1,128], index: 6, kind: output, shape index: {}]  }
   0x1   :  { %13 = vsyncpa [#allocation4 + $0x1], 0  ;;  %s1169_s21 = smov 0   ;;  %s1171_s22 = smov 0  }
   0x2   :  { %s1173_s23 = smov 0   ;;  %s1175_s24 = smov 0  }
   0x3 LB: > { %s893_s25 = sadd.s32 4294967295, %s1123_s24   ;;  %s894_s26 = sadd.s32 4294967294, %s1123_s24   ;;  %s1123_s24 = sphi %s1175_s24, %s1392_s24   ;;  %s1119_s23 = sphi %s1173_s23, %s1391_s23   ;;  %s1115_s22 = sphi %s1171_s22, %s1390_s22   ;;  %s1111_s21 = sphi %s1169_s21, %s1389_s21  }
   0x4   : > { %s1192_s27 = sadd.s32 1, %s1123_s24   ;;  %s26_s28 = sadd.s32 1, %s1119_s23 }
   0x5   : > { %s23_s29 = ssub.s32 %s1123_s24, %s1192_s27  ;;  %p33_p0 = scmp.ne.s32.totalorder %s1119_s23, %s1115_s22 }
   0x6   : > { %p24_p1 = scmp.eq.s32.totalorder %s23_s29, 0  ;;  %p34_p2 = scmp.eq.s32.totalorder %s1123_s24, 0 }
   0x7   : > { %p168_p3 = scmp.eq.s32.totalorder %s893_s25, 1  ;;  %p173_p4 = scmp.ne.s32.totalorder %s1115_s22, %s1111_s21 }
   0x8   : > { %s1205_s30 = scalar_select %p24_p1, %s1119_s23, %s26_s28  }
   0x9   : > { %p35_p5 = por %p34_p2, %p33_p0  ;;  %p1207_p6 = por %p168_p3, %p33_p0 }
   0xa   : > { %p174_p7 = scmp.eq.s32.totalorder %s894_s26, 1  ;;  %p1385_p9 = scmp.ge.s32.totalorder %s1123_s24, 2 }
   0xc   : > { %p1211_p8 = por %p174_p7, %p173_p4  ;;  %205 = sbr.rel (%p1385_p9) target bundleno = 23 (0x17), region = 36 }
  0x11   : > { %208 = sbr.rel (!%p35_p5) target bundleno = 23 (0x17), region = 40  ;;  %s210_s9 = sand.u32 (%p35_p5), 1, %s1119_s23  }
  0x12   : > { %s898_s10 = sshll.u32 (%p35_p5), %s1123_s24, 3  ;;  %s897_s11 = sshll.u32 (%p35_p5), %s210_s9, 5 }
  0x13   : > { %s214_s14 = scalar_lea.vmem (%p35_p5), %s1378_s0, %s898_s10  ;;  %s212_s15 = scalar_lea.vmem (%p35_p5), [#allocation2], %s897_s11 }
  0x14   : > { %v249_v0 = vld [vmem:[%s214_s14] sm:$0xff] (%p35_p5)  ;;  %v251_v1 = vld [vmem:[%s214_s14 + $0x10] sm:$0xff] (%p35_p5) }
  0x15   : > { %v253_v2 = vld [vmem:[%s214_s14 + $0x20] sm:$0xff] (%p35_p5)  ;;  %250 = vst [vmem:[%s212_s15] sm:$0xff] (%p35_p5), %v249_v0  ;;  %252 = vst [vmem:[%s212_s15 + $0x8] sm:$0xff] (%p35_p5), %v251_v1  ;;  %v255_v3 = vld [vmem:[%s214_s14 + $0x30] sm:$0xff] (%p35_p5) }
  0x16   : > { %254 = vst [vmem:[%s212_s15 + $0x10] sm:$0xff] %v253_v2  ;;  %256 = vst [vmem:[%s212_s15 + $0x18] sm:$0xff] %v255_v3 }
  0x17 PF: > { %p899_p10 = scmp.ge.s32.totalorder %s1123_s24, 1  ;;  %p261_p11 = scmp.lt.s32.totalorder %s1123_s24, 3 }
  0x19   : > { %p262_p12 = pnand %p899_p10, %p261_p11 }
  0x1a   : > { %s1276_s19 = sand.u32 (!%p262_p12), 1, %s1115_s22   ;;  %s913_s17 = sshll.u32 (!%p262_p12), %s893_s25, 4 }
  0x1b   : > { %265 = sbr.rel (%p262_p12) target bundleno = 760 (0x2f8), region = 78  ;;  %s900_s20 = sshll.u32 (!%p262_p12), %s1276_s19, 5 }
  0x1c   : > { %s270_s26 = scalar_lea.vmem (!%p262_p12), [#allocation2], %s900_s20  ;;  %s295_s18 = scalar_lea.vmem (!%p262_p12), [#allocation3], %s1276_s19 }
  0x1d   : > { %s833_s20 = sshll.u32 (!%p262_p12), %s295_s18, 4  ;;  %s831_s29 = scalar_lea.hbm (!%p262_p12), %s1384_s6, %s913_s17  ;;  %s834_s20 = int_to_ptr.vmem [resolvable:$true] %s833_s20 }
  0x1e   : > { %s821_s9 = scalar_lea.sflag (!%p262_p12), [#allocation4], %s1276_s19  ;;  %s1063_s10 = scalar_lea.vmem (!%p262_p12), %s834_s20, 16 }
  0x1f   : > { %p1064_p13 = scmp.ne.s32.totalorder (!%p262_p12), %s834_s20, %s1063_s10  ;;  %s1133_s11 = smov (!%p262_p12), [#allocation3]  }
  0x20   : > { %v303_v4 = vld [vmem:[%s1379_s1 + $0x10] sm:$0xff]  ;;  %v1125_v5 = vmov 1   ;;  %v1126_v6 = vmov 0   ;;  %v304_v7 = vld [vmem:[%s1379_s1 + $0x18] sm:$0x1]  ;;  %v301_v9 = vld [vmem:[%s1379_s1] sm:$0xff] }
  0x21   : > { %1006 = vset.pattern.permute.xlu1 %v1125_v5  ;;  %1005 = vset.pattern.permute.xlu0 %v1126_v6  ;;  %v1008_v8 = vpack.i.bf16 %v304_v7, %v303_v4  ;;  %v1127_v10 = vmov 2   ;;  %v302_v11 = vld [vmem:[%s1379_s1 + $0x8] sm:$0xff]  ;;  %v1128_v12 = vmov 3   ;;  %v1129_v14 = vmov 0.0   ;;  %v510_v15 = vld [vmem:[%s1380_s2] sm:$0x1]  ;;  %p1065_p0 = pnand %p1064_p13, %p1207_p6 }
  0x22   : > { %338 = vperm.xlu1 %1006, %v303_v4   ;;  %317 = vperm.xlu0 %1005, %v303_v4   ;;  %v1022_v13 = vpack.i.bf16 %v302_v11, %v301_v9  ;;  %vm1130_vm0 = vmmov 0   ;;  %v482_v16 = vld [vmem:[%s1380_s2] sm:$0xff]  ;;  %v483_v17 = vld [vmem:[%s1380_s2 + $0x8] sm:$0xff]  ;;  %v484_v18 = vld [vmem:[%s1380_s2 + $0x10] sm:$0xff]  ;;  %vm419_vm1 = vcmask 1043456   ;;  %vm420_vm2 = vcmask 1044480  }
  0x23   : > { %926 = vmatprep.subr.bf16.mxu0 %v1129_v14  ;;  %942 = vmatprep.subr.bf16.mxu1 %v1129_v14  ;;  %v485_v19 = vld [vmem:[%s1380_s2 + $0x18] sm:$0xff]  ;;  %v299_v24 = vld [vmem:[%s270_s26 + $0x10] sm:$0xff]  ;;  %v1131_v36 = vmov 65535   ;;  %v297_v46 = vld [vmem:[%s270_s26] sm:$0xff]  ;;  %vm409_vm3 = vcmask 203776   ;;  %vm610_vm4 = vcmask 261120   ;;  %p1066_p1 = pneg %p1065_p0 }
  0x24   : > { %930 = vmatprep.mubr.msk.bf16.mxu0 %vm1130_vm0, %v1129_v14  ;;  %946 = vmatprep.mubr.msk.bf16.mxu1 %vm1130_vm0, %v1129_v14  ;;  %v300_v25 = vld [vmem:[%s270_s26 + $0x18] sm:$0x1]  ;;  %v421_v37 = vsel %vm419_vm1, 4294967295, %v1131_v36  ;;  %v298_v47 = vld [vmem:[%s270_s26 + $0x8] sm:$0xff]  ;;  %v1053_v2 = vld [vmem:[%s1381_s3] sm:$0xff]   ;;  %s1067_s12 = sshll.u32 %s1133_s11, 4  ;;  %s1068_s12 = int_to_ptr.vmem [resolvable:$false] %s1067_s12 }
  0x25   : > { %v422_v45 = vsel %vm420_vm2, %v421_v37, 0  ;;  %v1054_v3 = vld [vmem:[%s1381_s3 + $0x8] sm:$0xff]   ;;  %v1055_v4 = vld [vmem:[%s1381_s3 + $0x10] ss:$0 sps:$4 sm:$0x11]   ;;  %s1069_s25 = scalar_lea.vmem %s1068_s12, 32  ;;  %p1070_p2 = scmp.lt.s32.totalorder %s834_s20, %s1068_s12 }
  0x26   : > { %342 = vperm.xlu1 %1006, %v304_v7   ;;  %322 = vperm.xlu0 %1005, %v304_v7   ;;  %v704_v7 = vld [vmem:[%s1382_s4] sm:$0x1]  ;;  %p1071_p3 = scmp.lt.s32.totalorder %s1069_s25, %s1063_s10 }
  0x28   : > { %p1072_p4 = por %p1071_p3, %p1070_p2 }
  0x2a   : > { %1013 = vset.pattern.permute.xlu1 %v1126_v6  ;;  %1007 = vset.pattern.permute.xlu0 %v1127_v10  ;;  %p1073_p5 = pnand %p1072_p4, %p1066_p1 }
  0x2b   : > { %1009 = vperm.xlu0 %1007, %v1008_v8   ;;  %307 = vperm.xlu1 %1013, %v301_v9  }
  0x2f   : > { %1014 = vset.pattern.permute.xlu0 %v1128_v12  ;;  %312 = vperm.xlu1 %1013, %v302_v11  }
  0x30   : > { %1016 = vperm.xlu0 %1014, %v1008_v8   ;;  %v676_v8 = vld [vmem:[%s1382_s4] sm:$0xff] }
  0x33   : > { %1020 = vset.pattern.permute.xlu1 %v1125_v5 }
  0x34   : > { %1021 = vset.pattern.permute.xlu0 %v1127_v10  ;;  %330 = vperm.xlu1 %1020, %v301_v9   ;;  %v1132_v9 = vmov 4  }
  0x35   : > { %1023 = vperm.xlu0 %1021, %v1022_v13  }
  0x38   : > { %334 = vperm.xlu1 %1020, %v302_v11   ;;  %v679_v11 = vld [vmem:[%s1382_s4 + $0x18] sm:$0xff] }
  0x39   : > { %1033 = vset.pattern.permute.xlu0 %v1126_v6 }
  0x3a   : > { %488 = vperm.xlu0 %1033, %v482_v16  }
  0x3c   : > { %1027 = vset.pattern.permute.xlu1 %v1128_v12 }
  0x3d   : > { %1029 = vperm.xlu1 %1027, %v1022_v13   ;;  %v677_v13 = vld [vmem:[%s1382_s4 + $0x8] sm:$0xff] }
  0x3e   : > { %503 = vperm.xlu0 %1033, %v485_v19  }
  0x41   : > { %513 = vperm.xlu1 %1027, %v510_v15   ;;  %v678_v15 = vld [vmem:[%s1382_s4 + $0x10] sm:$0xff] }
  0x42   : > { %1036 = vset.pattern.permute.xlu0 %v1125_v5 }
  0x43   : > { %559 = vperm.xlu0 %1036, %v485_v19  }
  0x45   : > { %1034 = vset.pattern.permute.xlu1 %v1126_v6 }
  0x46   : > { %493 = vperm.xlu1 %1034, %v483_v17  }
  0x47   : > { %547 = vperm.xlu0 %1036, %v482_v16  }
  0x4a   : > { %498 = vperm.xlu1 %1034, %v484_v18  }
  0x4b   : > { %1039 = vset.pattern.permute.xlu0 %v1127_v10 }
  0x4c   : > { %567 = vperm.xlu0 %1039, %v482_v16  }
  0x4e   : > { %1035 = vset.pattern.permute.xlu1 %v1125_v5 }
  0x4f   : > { %555 = vperm.xlu1 %1035, %v484_v18  }
  0x50   : > { %1042 = vset.pattern.permute.xlu0 %v1126_v6 }
  0x51   : > { %682 = vperm.xlu0 %1042, %v676_v8  }
  0x53   : > { %1037 = vset.pattern.permute.xlu1 %v1127_v10 }
  0x54   : > { %575 = vperm.xlu1 %1037, %v484_v18  }
  0x55   : > { %697 = vperm.xlu0 %1042, %v679_v11  }
  0x58   : > { %579 = vperm.xlu1 %1037, %v485_v19  }
  0x59   : > { %1045 = vset.pattern.permute.xlu0 %v1125_v5 }
  0x5a   : > { %744 = vperm.xlu0 %1045, %v677_v13  }
  0x5c   : > { %1038 = vset.pattern.permute.xlu1 %v1125_v5 }
  0x5d   : > { %551 = vperm.xlu1 %1038, %v483_v17  }
  0x5e   : > { %1047 = vset.pattern.permute.xlu0 %v1127_v10 }
  0x5f   : > { %764 = vperm.xlu0 %1047, %v677_v13  }
  0x61   : > { %1040 = vset.pattern.permute.xlu1 %v1127_v10 }
  0x62   : > { %571 = vperm.xlu1 %1040, %v483_v17  }
  0x63   : > { %772 = vperm.xlu0 %1047, %v679_v11  }
  0x66   : > { %1041 = vset.pattern.permute.xlu1 %v1132_v9 }
  0x67   : > { %707 = vperm.xlu1 %1041, %v704_v7   ;;  %1051 = vset.pattern.permute.xlu0 %v1128_v12 }
  0x68   : > { %788 = vperm.xlu0 %1051, %v677_v13  }
  0x6b   : > { %1043 = vset.pattern.permute.xlu1 %v1126_v6  ;;  %v812_v6 = vld [vmem:[%s1382_s4 + $0x1] sm:$0x1] }
  0x6c   : > { %687 = vperm.xlu1 %1043, %v677_v13   ;;  %1052 = vset.pattern.permute.xlu0 %v1132_v9 }
  0x6d   : > { %815 = vperm.xlu0 %1052, %v812_v6  }
  0x70   : > { %692 = vperm.xlu1 %1043, %v678_v15  }
  0x74   : > { %1044 = vset.pattern.permute.xlu1 %v1125_v5 }
  0x75   : > { %740 = vperm.xlu1 %1044, %v676_v8  }
  0x79   : > { %748 = vperm.xlu1 %1044, %v678_v15  }
  0x7d   : > { %1046 = vset.pattern.permute.xlu1 %v1127_v10 }
  0x7e   : > { %760 = vperm.xlu1 %1046, %v676_v8  }
  0x82   : > { %1048 = vset.pattern.permute.xlu1 %v1125_v5 }
  0x83   : > { %752 = vperm.xlu1 %1048, %v679_v11  }
  0x87   : > { %1049 = vset.pattern.permute.xlu1 %v1127_v10 }
  0x88   : > { %768 = vperm.xlu1 %1049, %v678_v15  }
  0x8c   : > { %1050 = vset.pattern.permute.xlu1 %v1128_v12 }
  0x8d   : > { %784 = vperm.xlu1 %1050, %v676_v8  }
  0x91   : > { %792 = vperm.xlu1 %1050, %v678_v15  }
  0x95   : > { %796 = vperm.xlu1 %1050, %v679_v11  }
  0x9d   : > { %v339_v20 = vpop.permute.xlu1 %338  ;;  %v318_v21 = vpop.permute.xlu0 %317 }
  0x9e   : > { %v327_v26 = vsub.f32 %v299_v24, %v318_v21  ;;  %v517_v21 = vlaneseq }
  0xa0   : > { %v347_v32 = vmul.f32 %v339_v20, %v327_v26 }
  0xa1   : > { %v343_v22 = vpop.permute.xlu1 %342  ;;  %v323_v23 = vpop.permute.xlu0 %322 }
  0xa2   : > { %v328_v27 = vsub.f32 %v300_v25, %v323_v23  ;;  %v1320_v25 = vshrl.u32 %v517_v21, 7 }
  0xa4   : > { %v348_v33 = vmul.f32 %v343_v22, %v328_v27  ;;  %v519_v10 = vsub.s32 0, %v1320_v25 }
  0xa6   : > { %v1010_v28 = vpop.permute.xlu0 %1009  ;;  %v308_v29 = vpop.permute.xlu1 %307 }
  0xa7   : > { %v1012_v30 = vunpack.i.h.bf16 %v1010_v28  ;;  %v1011_v31 = vunpack.i.l.bf16 %v1010_v28  ;;  %v325_v51 = vsub.f32 %v297_v46, %v308_v29 }
  0xa9   : > { %v367_v38 = vmax.f32 %v1011_v31, %v347_v32  ;;  %v368_v39 = vmax.f32 %v1012_v30, %v348_v33 }
  0xaa   : > { %v313_v34 = vpop.permute.xlu1 %312 }
  0xab   : > { %v1017_v35 = vpop.permute.xlu0 %1016  ;;  %v326_v52 = vsub.f32 %v298_v47, %v313_v34 }
  0xac   : > { %v1019_v40 = vunpack.i.h.bf16 %v1017_v35  ;;  %v1018_v41 = vunpack.i.l.bf16 %v1017_v35 }
  0xae   : > { %v387_v42 = vmin.f32 %v1018_v41, %v367_v38  ;;  %v388_v43 = vmin.f32 %v1019_v40, %v368_v39 }
  0xaf   : > { %v331_v44 = vpop.permute.xlu1 %330 }
  0xb0   : > { %v395_v48 = vpack.c.bf16 %v388_v43, %v387_v42  ;;  %v1024_v49 = vpop.permute.xlu0 %1023  ;;  %v345_v54 = vmul.f32 %v331_v44, %v325_v51 }
  0xb1   : > { %v1026_v55 = vunpack.i.h.bf16 %v1024_v49  ;;  %v1025_v56 = vunpack.i.l.bf16 %v1024_v49 }
  0xb2   : > { %v424_v50 = vand.u32 %v422_v45, %v395_v48 }
  0xb3   : > { %v335_v53 = vpop.permute.xlu1 %334  ;;  %v365_v59 = vmax.f32 %v1025_v56, %v345_v54 }
  0xb4   : > { %927 = vmatpush3.bf16.msra.mxu0 %v424_v50  ;;  %v346_v57 = vmul.f32 %v335_v53, %v326_v52 }
  0xb5   : > { %928 = vmatprep.subr.bf16.mxu0 %v1129_v14  ;;  %v489_v26 = vpop.permute.xlu0 %488 }
  0xb6   : > { %v366_v60 = vmax.f32 %v1026_v55, %v346_v57 }
  0xb8   : > { %v1030_v58 = vpop.permute.xlu1 %1029 }
  0xb9   : > { %v1032_v61 = vunpack.i.h.bf16 %v1030_v58  ;;  %v1031_v62 = vunpack.i.l.bf16 %v1030_v58  ;;  %v504_v12 = vpop.permute.xlu0 %503 }
  0xbb   : > { %v385_v63 = vmin.f32 %v1031_v62, %v365_v59  ;;  %v386_v0 = vmin.f32 %v1032_v61, %v366_v60 }
  0xbc   : > { %v514_v19 = vpop.permute.xlu1 %513 }
  0xbd   : > { %v394_v1 = vpack.c.bf16 %v386_v0, %v385_v63 }
  0xbe   : > { %v560_v60 = vpop.permute.xlu0 %559 }
  0xbf   : > { %929 = vmatpush3.bf16.msra.mxu0 %v394_v1 }
  0xc1   : > { %v494_v23 = vpop.permute.xlu1 %493 }
  0xc2   : > { %931 = vmatmul.mubr.msk.bf16.vlgmr.msra.gmra.mxu0 %vm409_vm3, %v1053_v2  ;;  %v548_v62 = vpop.permute.xlu0 %547 }
  0xc3   : > { %934 = vmatprep.mubr.msk.bf16.mxu0 %vm1130_vm0, %v1129_v14 }
  0xc5   : > { %v499_v28 = vpop.permute.xlu1 %498 }
  0xc7   : > { %v568_v7 = vpop.permute.xlu0 %567 }
  0xca   : > { %935 = vmatmul.mubr.msk.bf16.gmra.mxu0 %vm409_vm3, %v1054_v3  ;;  %v556_v55 = vpop.permute.xlu1 %555 }
  0xcb   : > { %938 = vmatprep.mubr.msk.bf16.mxu0 %vm1130_vm0, %v1129_v14 }
  0xcf   : > { %v576_v59 = vpop.permute.xlu1 %575 }
  0xd2   : > { %939 = vmatmul.mubr.msk.bf16.gmra.mxu0 %vm409_vm3, %v1055_v4 }
  0xd3   : > { %v580_v61 = vpop.permute.xlu1 %579 }
  0xd8   : > { %v552_v63 = vpop.permute.xlu1 %551 }
  0xdd   : > { %v572_v8 = vpop.permute.xlu1 %571 }
 0x182   : > { %v460_v16 = vpop.f32.mrf.mxu0 }
 0x183   : > { %v506_v32 = vadd.f32 %v489_v26, %v460_v16  ;;  %v1057_v26 = vld [vmem:[%s1383_s5 + $0x8] sm:$0xff]  }
 0x184   : > { %v932_v17 = vpop.f32.mrf.mxu0 }
 0x186   : > { %v463_v18 = vpop.f32.mrf.mxu0 }
 0x187   : > { %v507_v33 = vadd.f32 %v494_v23, %v463_v18 }
 0x188   : > { %v933_v20 = vpop.f32.mrf.mxu0 }
 0x18a   : > { %v468_v22 = vpop.f32.mrf.mxu0 }
 0x18b   : > { %v508_v34 = vadd.f32 %v499_v28, %v468_v22 }
 0x18c   : > { %v936_v24 = vpop.f32.mrf.mxu0 }
 0x18e   : > { %v471_v5 = vpop.f32.mrf.mxu0 }
 0x18f   : > { %v509_v37 = vadd.f32 %v504_v12, %v471_v5  ;;  %v1056_v5 = vld [vmem:[%s1383_s5] sm:$0xff]  }
 0x190   : > { %v937_v27 = vpop.f32.mrf.mxu0 }
 0x191   : > { %v1058_v27 = vld [vmem:[%s1383_s5 + $0x10] ss:$0 sps:$4 sm:$0x11]  }
 0x192   : > { %v476_v29 = vpop.f32.mrf.mxu0 }
 0x193   : > { %v516_v30 = vadd.f32 %v514_v19, %v476_v29 }
 0x194   : > { %v940_v31 = vpop.f32.mrf.mxu0 }
 0x195   : > { %v520_v35 = vrot.slane %v516_v30, %v519_v10  ;;  %v708_v30 = vpop.permute.xlu1 %707 }
 0x196   : > { %v479_v36 = vpop.f32.mrf.mxu0 }
 0x197   : > { %v521_v38 = vsub.f32 %v506_v32, %v520_v35  ;;  %v522_v39 = vsub.f32 %v507_v33, %v520_v35  ;;  %v523_v40 = vsub.f32 %v508_v34, %v520_v35  ;;  %v524_v42 = vsub.f32 %v509_v37, %v520_v35  ;;  %v683_v36 = vpop.permute.xlu0 %682 }
 0x198   : > { %v941_v41 = vpop.f32.mrf.mxu0 }
 0x199   : > { %v525_v43 = vmul.f32 %v521_v38, %v521_v38  ;;  %v526_v44 = vmul.f32 %v522_v39, %v522_v39  ;;  %v527_v45 = vmul.f32 %v523_v40, %v523_v40  ;;  %v528_v47 = vmul.f32 %v524_v42, %v524_v42  ;;  %v688_v33 = vpop.permute.xlu1 %687 }
 0x19b   : > { %v529_v46 = vadd.f32 %v526_v44, %v525_v43 }
 0x19d   : > { %v530_v48 = vadd.f32 %v529_v46, %v527_v45 }
 0x19f   : > { %v531_v49 = vadd.f32 %v530_v48, %v528_v47 }
 0x1a1   : > { %v532_v50 = vrot.slane %v531_v49, 4 }
 0x1a3   : > { %v533_v51 = vadd.f32 %v532_v50, %v531_v49 }
 0x1a5   : > { %v534_v52 = vrot.slane %v533_v51, 2 }
 0x1a7   : > { %v535_v53 = vadd.f32 %v534_v52, %v533_v51 }
 0x1a9   : > { %v536_v54 = vrot.slane %v535_v53, 1 }
 0x1ab   : > { %v537_v56 = vadd.f32 %v536_v54, %v535_v53 }
 0x1ad   : > { %v539_v57 = vmul.f32 0.03125, %v537_v56 }
 0x1af   : > { %v540_v58 = vadd.f32 1e-05, %v539_v57 }
 0x1b1   : > { %1059 = vrsqrt.f32 %v540_v58 }
 0x1be   : > { %v1060_v0 = vpop.eup %1059 }
 0x1bf   : > { %v544_v1 = vmul.f32 %v1060_v0, %v523_v40  ;;  %v545_v2 = vmul.f32 %v1060_v0, %v524_v42  ;;  %v542_v3 = vmul.f32 %v1060_v0, %v521_v38  ;;  %v543_v4 = vmul.f32 %v1060_v0, %v522_v39  ;;  %v693_v38 = vpop.permute.xlu1 %692 }
 0x1c1   : > { %v564_v9 = vmul.f32 %v556_v55, %v544_v1  ;;  %v565_v11 = vmul.f32 %v560_v60, %v545_v2  ;;  %v562_v13 = vmul.f32 %v548_v62, %v542_v3  ;;  %v563_v15 = vmul.f32 %v552_v63, %v543_v4 }
 0x1c3   : > { %v584_v6 = vadd.f32 %v576_v59, %v564_v9  ;;  %v585_v16 = vadd.f32 %v580_v61, %v565_v11  ;;  %v582_v17 = vadd.f32 %v568_v7, %v562_v13  ;;  %v583_v18 = vadd.f32 %v572_v8, %v563_v15  ;;  %v741_v60 = vpop.permute.xlu1 %740 }
 0x1c5   : > { %v588_v19 = vmax.f32 %v584_v6, 0.0  ;;  %v589_v20 = vmax.f32 %v585_v16, 0.0  ;;  %v586_v21 = vmax.f32 %v582_v17, 0.0  ;;  %v587_v22 = vmax.f32 %v583_v18, 0.0 }
 0x1c7   : > { %v596_v23 = vpack.c.bf16 %v589_v20, %v588_v19  ;;  %v595_v24 = vpack.c.bf16 %v587_v22, %v586_v21  ;;  %v749_v25 = vpop.permute.xlu1 %748 }
 0x1c9   : > { %943 = vmatpush3.bf16.msra.mxu1 %v596_v23 }
 0x1ca   : > { %944 = vmatprep.subr.bf16.mxu1 %v1129_v14 }
 0x1cb   : > { %v761_v2 = vpop.permute.xlu1 %760 }
 0x1cd   : > { %945 = vmatpush3.bf16.msra.mxu1 %v595_v24 }
 0x1cf   : > { %v753_v7 = vpop.permute.xlu1 %752 }
 0x1d0   : > { %947 = vmatmul.mubr.msk.bf16.vlgmr.msra.gmra.mxu1 %vm610_vm4, %v1056_v5 }
 0x1d1   : > { %950 = vmatprep.mubr.msk.bf16.mxu1 %vm1130_vm0, %v1129_v14 }
 0x1d3   : > { %v769_v9 = vpop.permute.xlu1 %768 }
 0x1d7   : > { %v785_v15 = vpop.permute.xlu1 %784 }
 0x1d8   : > { %951 = vmatmul.mubr.msk.bf16.gmra.mxu1 %vm610_vm4, %v1057_v26 }
 0x1d9   : > { %954 = vmatprep.mubr.msk.bf16.mxu1 %vm1130_vm0, %v1129_v14  ;;  %v698_v14 = vpop.permute.xlu0 %697 }
 0x1dd   : > { %v745_v8 = vpop.permute.xlu0 %744 }
 0x1e0   : > { %955 = vmatmul.mubr.msk.bf16.gmra.mxu1 %vm610_vm4, %v1058_v27 }
 0x1e1   : > { %v765_v11 = vpop.permute.xlu0 %764 }
 0x1e5   : > { %v773_v19 = vpop.permute.xlu0 %772 }
 0x290   : > { %v654_v28 = vpop.f32.mrf.mxu1 }
 0x291   : > { %v700_v42 = vadd.f32 %v683_v36, %v654_v28  ;;  %v793_v28 = vpop.permute.xlu1 %792 }
 0x292   : > { %v948_v29 = vpop.f32.mrf.mxu1 }
 0x293   : > { %v789_v29 = vpop.permute.xlu0 %788 }
 0x294   : > { %v657_v12 = vpop.f32.mrf.mxu1 }
 0x295   : > { %v701_v43 = vadd.f32 %v688_v33, %v657_v12 }
 0x296   : > { %v949_v31 = vpop.f32.mrf.mxu1 }
 0x298   : > { %v662_v32 = vpop.f32.mrf.mxu1 }
 0x299   : > { %v702_v44 = vadd.f32 %v693_v38, %v662_v32 }
 0x29a   : > { %v952_v34 = vpop.f32.mrf.mxu1 }
 0x29c   : > { %v665_v35 = vpop.f32.mrf.mxu1 }
 0x29d   : > { %v703_v47 = vadd.f32 %v698_v14, %v665_v35 }
 0x29e   : > { %v953_v37 = vpop.f32.mrf.mxu1 }
 0x29f   : > { %v797_v37 = vpop.permute.xlu1 %796 }
 0x2a0   : > { %v670_v39 = vpop.f32.mrf.mxu1 }
 0x2a1   : > { %v710_v40 = vadd.f32 %v708_v30, %v670_v39 }
 0x2a2   : > { %v956_v41 = vpop.f32.mrf.mxu1 }
 0x2a3   : > { %v714_v45 = vrot.slane %v710_v40, %v519_v10 }
 0x2a4   : > { %v673_v46 = vpop.f32.mrf.mxu1 }
 0x2a5   : > { %v716_v48 = vsub.f32 %v701_v43, %v714_v45  ;;  %v717_v49 = vsub.f32 %v702_v44, %v714_v45  ;;  %v715_v50 = vsub.f32 %v700_v42, %v714_v45  ;;  %v718_v52 = vsub.f32 %v703_v47, %v714_v45  ;;  %v816_v45 = vpop.permute.xlu0 %815 }
 0x2a6   : > { %v957_v51 = vpop.f32.mrf.mxu1 }
 0x2a7   : > { %v719_v53 = vmul.f32 %v715_v50, %v715_v50  ;;  %v720_v54 = vmul.f32 %v716_v48, %v716_v48  ;;  %v721_v55 = vmul.f32 %v717_v49, %v717_v49  ;;  %v722_v57 = vmul.f32 %v718_v52, %v718_v52 }
 0x2a9   : > { %v723_v56 = vadd.f32 %v720_v54, %v719_v53 }
 0x2ab   : > { %v724_v58 = vadd.f32 %v723_v56, %v721_v55 }
 0x2ad   : > { %v725_v59 = vadd.f32 %v724_v58, %v722_v57 }
 0x2af   : > { %v726_v61 = vrot.slane %v725_v59, 4 }
 0x2b1   : > { %v727_v62 = vadd.f32 %v726_v61, %v725_v59 }
 0x2b3   : > { %v728_v63 = vrot.slane %v727_v62, 2 }
 0x2b5   : > { %v729_v10 = vadd.f32 %v728_v63, %v727_v62 }
 0x2b7   : > { %v730_v0 = vrot.slane %v729_v10, 1 }
 0x2b9   : > { %v731_v1 = vadd.f32 %v730_v0, %v729_v10 }
 0x2bb   : > { %v732_v3 = vmul.f32 0.03125, %v731_v1 }
 0x2bd   : > { %v733_v4 = vadd.f32 1e-05, %v732_v3 }
 0x2bf   : > { %1061 = vrsqrt.f32 %v733_v4 }
 0x2cc   : > { %v1062_v13 = vpop.eup %1061 }
 0x2cd   : > { %v735_v6 = vmul.f32 %v1062_v13, %v715_v50  ;;  %v737_v16 = vmul.f32 %v1062_v13, %v717_v49  ;;  %v738_v17 = vmul.f32 %v1062_v13, %v718_v52  ;;  %v736_v18 = vmul.f32 %v1062_v13, %v716_v48 }
 0x2cf   : > { %v755_v20 = vmul.f32 %v741_v60, %v735_v6  ;;  %v757_v21 = vmul.f32 %v749_v25, %v737_v16  ;;  %v758_v22 = vmul.f32 %v753_v7, %v738_v17  ;;  %v756_v23 = vmul.f32 %v745_v8, %v736_v18 }
 0x2d1   : > { %v775_v24 = vadd.f32 %v761_v2, %v755_v20  ;;  %v777_v5 = vadd.f32 %v769_v9, %v757_v21  ;;  %v776_v26 = vadd.f32 %v765_v11, %v756_v23  ;;  %v778_v27 = vadd.f32 %v773_v19, %v758_v22 }
 0x2d3   : > { %v779_v30 = vmax.f32 %v775_v24, 0.0  ;;  %v781_v12 = vmax.f32 %v777_v5, 0.0  ;;  %v780_v31 = vmax.f32 %v776_v26, 0.0  ;;  %v782_v33 = vmax.f32 %v778_v27, 0.0 }
 0x2d5   : > { %v799_v32 = vmul.f32 %v785_v15, %v779_v30  ;;  %v800_v34 = vmul.f32 %v789_v29, %v780_v31  ;;  %v801_v35 = vmul.f32 %v793_v28, %v781_v12  ;;  %v802_v38 = vmul.f32 %v797_v37, %v782_v33 }
 0x2d7   : > { %v803_v36 = vadd.f32 %v800_v34, %v799_v32 }
 0x2d9   : > { %v804_v39 = vadd.f32 %v803_v36, %v801_v35 }
 0x2db   : > { %v805_v40 = vadd.f32 %v804_v39, %v802_v38 }
 0x2dd   : > { %v806_v14 = vrot.slane %v805_v40, 4 }
 0x2df   : > { %v807_v41 = vadd.f32 %v806_v14, %v805_v40 }
 0x2e1   : > { %v808_v42 = vrot.slane %v807_v41, 2 }
 0x2e3   : > { %v809_v43 = vadd.f32 %v808_v42, %v807_v41 }
 0x2e5   : > { %v810_v44 = vrot.slane %v809_v43, 1 }
 0x2e7   : > { %v811_v46 = vadd.f32 %v810_v44, %v809_v43 }
 0x2e9   : > { %v818_v47 = vadd.f32 %v816_v45, %v811_v46 }
 0x2eb   : > { %819 = vst [vmem:[%s295_s18] sm:$0x1] %v818_v47 }
 0x2ec   : > { %1076 = shalt.err (!%p1073_p5)
}
 0x2ed   : > { %s1077_s13 = scalar_lea.hbm %s831_s29, 16  ;;  %s1081_s15 = scalar_lea.hbm %s1384_s6, 32 }
 0x2ee   : > { %p1078_p7 = scmp.ne.s32.totalorder %s831_s29, %s1077_s13  ;;  %p1082_p12 = scmp.lt.s32.totalorder %s831_s29, %s1384_s6 }
 0x2ef   : > { %p1083_p13 = scmp.lt.s32.totalorder %s1081_s15, %s1077_s13 }
 0x2f0   : > { %p1079_p10 = pnand %p1078_p7, %p1207_p6 }
 0x2f1   : > { %p1084_p0 = por %p1083_p13, %p1082_p12 }
 0x2f2   : > { %p1080_p11 = pneg %p1079_p10 }
 0x2f4   : > { %p1085_p9 = pnand %p1084_p0, %p1080_p11 }
 0x2f6   : > { %1088 = shalt.err (!%p1085_p9)
}
 0x2f7   : > { %958 = dma.vmem_to_hbm [thread:$0]  (%p1207_p6), %s834_s20, 16, %s831_s29, %s821_s9  }
 0x2f8 PF: > { %s845_s18 = sand.u32 1, %s1111_s21   ;;  %p1388_p1 = scmp.ge.s32.totalorder %s1123_s24, 2 }
 0x2f9   : > { %s846_s26 = scalar_lea.sflag [#allocation4], %s845_s18 }
 0x2fa   : > { %p961_p2 = pnand %p1388_p1, %p1211_p8 }
 0x2fc   : > { %p962_p3 = pneg %p961_p2 }
 0x2fe   : > { %1106 = dma.done.wait (%p962_p3), %s846_s26, 16  }
 0x2ff   : > { %1108 = vsyncadd (%p962_p3), %s846_s26, 4294967280  ;;  %p16_p9 = scmp.ge.s32.totalorder %s1192_s27, 4   ;;  %s1389_s21 = smov %s1115_s22 }
 0x300   : > { %s1390_s22 = smov %s1119_s23  ;;  %s1391_s23 = smov %s1205_s30 }
 0x301   : > { %s1392_s24 = smov %s1192_s27  ;;  %18 = sbr.rel (!%p16_p9) target bundleno = 3 (0x3), region = 122 }
 0x306   :  { %850 = vsyncpa [#allocation4], 1 }
 0x307   :  { %852 = vsyncpa [#allocation4 + $0x1], 1 }

</bundles_post_ra>
